<compile_context>
chip_gen: v7x
topology: tpu7x:2x2x1
jax: 0.10.0
libtpu: 0.0.40
codegen_flags: <defaults>
</compile_context>

<pallas_src>
import functools

import jax
import jax.numpy as jnp
from jax.experimental import pallas as pl
from jax.experimental.pallas import tpu as pltpu


def _round_up(x, m):
    return ((x + m - 1) // m) * m


def _vmem_caps():
    """(soft budget, hard cap) in bytes, generation-aware with a safe default."""
    cap = None
    try:
        info = pltpu.get_tpu_info()
        cap = getattr(info, "vmem_capacity_bytes", None)
    except Exception:
        cap = None
    if not cap:
        cap = 64 << 20  # conservative: v7x per-TensorCore VMEM
    cap = int(cap)
    return int(cap * 0.75), int(cap * 0.90)


def _default_compute_dtype():
    """bf16 on v6e/v7x (2x256^2 bf16 MXU), f32 otherwise."""
    try:
        kind = jax.devices()[0].device_kind.lower()
    except Exception:
        return jnp.dtype(jnp.float32)
    if any(tag in kind for tag in ("v6", "v7", "trillium")):
        return jnp.dtype(jnp.bfloat16)
    return jnp.dtype(jnp.float32)


# ---------------------------------------------------------------------------
# Kernel: the whole MLP for one (tm, :) row-tile of the activation.
#   refs = [x, w0, b0, w1, b1, ..., w_{L-1}, b_{L-1}, out]
# Activations stay live as values (VMEM/vregs) between layers; matmuls
# accumulate in f32 on the MXU; bias-add / ReLU stay in f32 on the VPU.
# ---------------------------------------------------------------------------
def _mlp_kernel(*refs, num_layers):
    x_ref = refs[0]
    wb_refs = refs[1:1 + 2 * num_layers]
    o_ref = refs[1 + 2 * num_layers]

    act = x_ref[...]
    for i in range(num_layers):
        w = wb_refs[2 * i][...]
        b = wb_refs[2 * i + 1][...]                 # (1, n) f32
        y = jnp.dot(act, w, preferred_element_type=jnp.float32) + b
        if i < num_layers - 1:
            act = jnp.maximum(y, 0.0).astype(w.dtype)   # ReLU, back to compute dtype
        else:
            o_ref[...] = y.astype(o_ref.dtype)


# ---------------------------------------------------------------------------
# Wrapper mirroring the PyTorch module's forward pass.
# ---------------------------------------------------------------------------
class PallasMLP:
    """Fused Pallas implementation of the PyTorch MLP forward pass."""

    def __init__(self, params, compute_dtype=None):
        self.compute_dtype = (jnp.dtype(compute_dtype) if compute_dtype is not None
                              else _default_compute_dtype())
        self.num_layers = len(params)
        self.dims = [(int(w.shape[0]), int(w.shape[1])) for w, _ in params]

        # Cast weights once (hoisted out of the forward path). Stored (in, out)
        # so the kernel computes y = x @ W + b directly. No lane padding: the
        # kernel uses full-extent blocks and Mosaic pads internally.
        self.weights = []
        for w, b in params:
            w_c = jnp.asarray(w, self.compute_dtype)
            b_c = jnp.asarray(b, jnp.float32).reshape(1, -1)
            self.weights.append((w_c, b_c))

        self._vmem_budget, self._vmem_hard_cap = _vmem_caps()
        self._single_buffer_ok = True  # flipped off once if Buffered(1) is rejected

        # TODO(synk): if the resident weights alone exceed the VMEM budget
        # (possible on v7x's 64 MiB for very wide layers), fall back to
        # streaming each layer's weights with pltpu.emit_pipeline / an N-tiled
        # grid instead of keeping all layers co-resident.

    # -- VMEM footprint heuristic (weights single-buffered by default) --------
    def _vmem_estimate(self, tm, out_dtype, single_buffer):
        ci = self.compute_dtype.itemsize
        in_dim = self.dims[0][0]
        out_dim = self.dims[-1][1]
        wbytes = sum(w.size * w.dtype.itemsize + b.size * b.dtype.itemsize
                     for w, b in self.weights)
        if not single_buffer:
            wbytes *= 2
        widest = max(max(k, n) for k, n in self.dims)
        est = wbytes
        est += 2 * tm * in_dim * ci                               # x tile, 2-buffered
        est += 2 * tm * out_dim * jnp.dtype(out_dtype).itemsize   # out tile, 2-buffered
        est += 3 * tm * widest * 4                                # live f32 values / acc
        return int(est)

    # -- One pallas_call over a 1-D row-tile grid ------------------------------
    def _forward_padded(self, x_p, tm, Mp, out_dtype, single_buffer):
        in_dim = self.dims[0][0]
        out_dim = self.dims[-1][1]
        L = self.num_layers

        def const_spec(shape):
            idx = lambda i, _n=len(shape): (0,) * _n
            if single_buffer and hasattr(pl, "Buffered"):
                try:
                    # Constant block: no need to double-buffer the weights.
                    return pl.BlockSpec(shape, idx, pipeline_mode=pl.Buffered(1))
                except TypeError:
                    pass
            return pl.BlockSpec(shape, idx)

        in_specs = [pl.BlockSpec((tm, in_dim), lambda i: (i, 0))]
        flat_inputs = [x_p]
        for w, b in self.weights:
            in_specs.append(const_spec(w.shape))
            in_specs.append(const_spec(b.shape))
            flat_inputs.extend([w, b])

        est = self._vmem_estimate(tm, out_dtype, single_buffer)
        vmem_limit = int(min(max(est + (16 << 20), 32 << 20), self._vmem_hard_cap))

        return pl.pallas_call(
            functools.partial(_mlp_kernel, num_layers=L),
            out_shape=jax.ShapeDtypeStruct((Mp, out_dim), out_dtype),
            grid_spec=pltpu.PrefetchScalarGridSpec(
                num_scalar_prefetch=0,
                grid=(Mp // tm,),
                in_specs=in_specs,
                out_specs=pl.BlockSpec((tm, out_dim), lambda i: (i, 0)),
            ),
            compiler_params=pltpu.CompilerParams(
                dimension_semantics=("parallel",),
                vmem_limit_bytes=vmem_limit,
            ),
        )(*flat_inputs)

    def __call__(self, x):
        in_dim = self.dims[0][0]
        out_dim = self.dims[-1][1]
        assert x.shape[-1] == in_dim
        lead = x.shape[:-1]
        x2d = x.reshape(-1, in_dim)
        M = x2d.shape[0]

        is_bf16 = self.compute_dtype == jnp.bfloat16
        out_dtype = (jnp.dtype(jnp.bfloat16)
                     if (is_bf16 and x.dtype == jnp.bfloat16)
                     else jnp.dtype(jnp.float32))

        # Row-tile: as large as useful (<=1024), shrunk to fit the VMEM budget,
        # then split so v7x's two TensorCores both get work.
        sub = 16 if is_bf16 else 8
        tm = min(1024, _round_up(max(M, 1), sub))
        while tm > sub and self._vmem_estimate(tm, out_dtype, True) > self._vmem_budget:
            tm = max(sub, _round_up(tm // 2, sub))
        if M > sub and pl.cdiv(M, tm) < 2:
            tm = max(sub, _round_up(pl.cdiv(M, 2), sub))
        Mp = _round_up(M, tm)

        # Only row padding / dtype cast; no lane padding and no full repack when
        # the shape already matches.
        if Mp == M and x2d.dtype == self.compute_dtype:
            x_p = x2d
        elif Mp == M:
            x_p = x2d.astype(self.compute_dtype)
        else:
            x_p = jnp.pad(x2d.astype(self.compute_dtype), ((0, Mp - M), (0, 0)))

        out = None
        if self._single_buffer_ok:
            try:
                out = self._forward_padded(x_p, tm, Mp, out_dtype, True)
            except Exception:
                self._single_buffer_ok = False  # fall back to default buffering
        if out is None:
            out = self._forward_padded(x_p, tm, Mp, out_dtype, False)

        y = out[:M].astype(x.dtype)
        return y.reshape(*lead, out_dim)


# ---------------------------------------------------------------------------
# Parameter init (matches nn.Linear's U(-1/sqrt(fan_in), 1/sqrt(fan_in)))
# and a pure-JAX reference for validation.
# ---------------------------------------------------------------------------
def init_mlp_params(key, input_dim, hidden_dim, output_dim, num_layers,
                    dtype=jnp.float32):
    h = [hidden_dim] * (num_layers - 1)
    dims = list(zip([input_dim] + h, h + [output_dim]))
    params = []
    for (n_in, n_out) in dims:
        key, kw, kb = jax.random.split(key, 3)
        bound = 1.0 / jnp.sqrt(jnp.asarray(n_in, dtype))
        # stored as (in, out) = transpose of PyTorch's (out, in)
        w = jax.random.uniform(kw, (n_in, n_out), dtype, -bound, bound)
        b = jax.random.uniform(kb, (n_out,), dtype, -bound, bound)
        params.append((w, b))
    return params


def mlp_reference(params, x):
    num_layers = len(params)
    for i, (w, b) in enumerate(params):
        x = x @ w + b
        if i < num_layers - 1:
            x = jnp.maximum(x, 0.0)
    return x


if __name__ == "__main__":
    key = jax.random.PRNGKey(0)

    # MLP(input_dim=32, hidden=64, output=16, num_layers=3) on a (2, 8, 32) tensor.
    input_dim, hidden_dim, output_dim, num_layers = 32, 64, 16, 3
    batch, seq = 2, 8

    k_params, k_x = jax.random.split(key)
    params = init_mlp_params(k_params, input_dim, hidden_dim, output_dim,
                             num_layers)
    x = jax.random.normal(k_x, (batch, seq, input_dim), jnp.float32)

    ref = mlp_reference(params, x)

    # f32 compute path: matches the reference tightly.
    mlp_f32 = PallasMLP(params, compute_dtype=jnp.float32)
    out = jax.block_until_ready(mlp_f32(x))
    assert out.shape == (batch, seq, output_dim), out.shape
    assert jnp.allclose(out, ref, atol=1e-5, rtol=1e-5), "f32 mismatch vs reference"

    # bf16 compute path (256-wide bf16 MXU on v6e/v7x; default on those chips).
    mlp_bf16 = PallasMLP(params, compute_dtype=jnp.bfloat16)
    out_bf16 = jax.block_until_ready(mlp_bf16(x))
    assert out_bf16.shape == (batch, seq, output_dim), out_bf16.shape
    assert jnp.allclose(out_bf16, ref, atol=1e-1, rtol=1e-1), "bf16 mismatch vs reference"

    print("KERNEL_OK")
</pallas_src>

<mosaic_0001>
module attributes {stable_mosaic.version = 11 : i64} {
  func.func @_mlp_kernel(%arg0: i32, %arg1: memref<8x32xf32, #tpu.memory_space<vmem>>, %arg2: memref<32x64xf32, #tpu.memory_space<vmem>>, %arg3: memref<1x64xf32, #tpu.memory_space<vmem>>, %arg4: memref<64x64xf32, #tpu.memory_space<vmem>>, %arg5: memref<1x64xf32, #tpu.memory_space<vmem>>, %arg6: memref<64x16xf32, #tpu.memory_space<vmem>>, %arg7: memref<1x16xf32, #tpu.memory_space<vmem>>, %arg8: memref<8x16xf32, #tpu.memory_space<vmem>>) attributes {dimension_semantics = [#tpu.dimension_semantics<parallel>], iteration_bounds = array<i64: 2>, scalar_prefetch = 0 : i64, scratch_operands = 0 : i64, tpu.core_type = #tpu.core_type<tc>, window_params = [{transform_indices = @transform_0, window_bounds = array<i64: 8, 32>}, {pipeline_mode = #tpu.pipeline_mode<synchronous>, transform_indices = @transform_1, window_bounds = array<i64: 32, 64>}, {pipeline_mode = #tpu.pipeline_mode<synchronous>, transform_indices = @transform_2, window_bounds = array<i64: 1, 64>}, {pipeline_mode = #tpu.pipeline_mode<synchronous>, transform_indices = @transform_3, window_bounds = array<i64: 64, 64>}, {pipeline_mode = #tpu.pipeline_mode<synchronous>, transform_indices = @transform_4, window_bounds = array<i64: 1, 64>}, {pipeline_mode = #tpu.pipeline_mode<synchronous>, transform_indices = @transform_5, window_bounds = array<i64: 64, 16>}, {pipeline_mode = #tpu.pipeline_mode<synchronous>, transform_indices = @transform_6, window_bounds = array<i64: 1, 16>}, {transform_indices = @transform_7, window_bounds = array<i64: 8, 16>}]} {
    %c0 = arith.constant 0 : index
    %c0_0 = arith.constant 0 : index
    %0 = vector.load %arg1[%c0, %c0_0] : memref<8x32xf32, #tpu.memory_space<vmem>>, vector<8x32xf32>
    %c0_1 = arith.constant 0 : index
    %c0_2 = arith.constant 0 : index
    %1 = vector.load %arg2[%c0_1, %c0_2] : memref<32x64xf32, #tpu.memory_space<vmem>>, vector<32x64xf32>
    %c0_3 = arith.constant 0 : index
    %c0_4 = arith.constant 0 : index
    %2 = vector.load %arg3[%c0_3, %c0_4] : memref<1x64xf32, #tpu.memory_space<vmem>>, vector<1x64xf32>
    %cst = arith.constant dense<0.000000e+00> : vector<8x64xf32>
    %3 = tpu.matmul %0, %1, %cst {dimension_numbers = #tpu.dot_dimension_numbers<[1], [0], [0], [1], [0, 0, 1, 1], [], []>} : vector<8x32xf32>, vector<32x64xf32>, vector<8x64xf32> -> vector<8x64xf32>
    %4 = vector.broadcast %2 : vector<1x64xf32> to vector<8x64xf32>
    %5 = arith.addf %3, %4 : vector<8x64xf32>
    %cst_5 = arith.constant 0.000000e+00 : f32
    %6 = vector.broadcast %cst_5 : f32 to vector<8x64xf32>
    %7 = arith.maximumf %5, %6 : vector<8x64xf32>
    %c0_6 = arith.constant 0 : index
    %c0_7 = arith.constant 0 : index
    %8 = vector.load %arg4[%c0_6, %c0_7] : memref<64x64xf32, #tpu.memory_space<vmem>>, vector<64x64xf32>
    %c0_8 = arith.constant 0 : index
    %c0_9 = arith.constant 0 : index
    %9 = vector.load %arg5[%c0_8, %c0_9] : memref<1x64xf32, #tpu.memory_space<vmem>>, vector<1x64xf32>
    %cst_10 = arith.constant dense<0.000000e+00> : vector<8x64xf32>
    %10 = tpu.matmul %7, %8, %cst_10 {dimension_numbers = #tpu.dot_dimension_numbers<[1], [0], [0], [1], [0, 0, 1, 1], [], []>} : vector<8x64xf32>, vector<64x64xf32>, vector<8x64xf32> -> vector<8x64xf32>
    %11 = vector.broadcast %9 : vector<1x64xf32> to vector<8x64xf32>
    %12 = arith.addf %10, %11 : vector<8x64xf32>
    %cst_11 = arith.constant 0.000000e+00 : f32
    %13 = vector.broadcast %cst_11 : f32 to vector<8x64xf32>
    %14 = arith.maximumf %12, %13 : vector<8x64xf32>
    %c0_12 = arith.constant 0 : index
    %c0_13 = arith.constant 0 : index
    %15 = vector.load %arg6[%c0_12, %c0_13] : memref<64x16xf32, #tpu.memory_space<vmem>>, vector<64x16xf32>
    %c0_14 = arith.constant 0 : index
    %c0_15 = arith.constant 0 : index
    %16 = vector.load %arg7[%c0_14, %c0_15] : memref<1x16xf32, #tpu.memory_space<vmem>>, vector<1x16xf32>
    %cst_16 = arith.constant dense<0.000000e+00> : vector<8x16xf32>
    %17 = tpu.matmul %14, %15, %cst_16 {dimension_numbers = #tpu.dot_dimension_numbers<[1], [0], [0], [1], [0, 0, 1, 1], [], []>} : vector<8x64xf32>, vector<64x16xf32>, vector<8x16xf32> -> vector<8x16xf32>
    %18 = vector.broadcast %16 : vector<1x16xf32> to vector<8x16xf32>
    %19 = arith.addf %17, %18 : vector<8x16xf32>
    %c0_17 = arith.constant 0 : index
    %c0_18 = arith.constant 0 : index
    %20 = vector.load %arg8[%c0_17, %c0_18] : memref<8x16xf32, #tpu.memory_space<vmem>>, vector<8x16xf32>
    tpu.vector_store %arg8[%c0_17, %c0_18], %19 {strides = array<i32>} : memref<8x16xf32, #tpu.memory_space<vmem>>, vector<8x16xf32>,
    return
  }
  func.func @transform_0(%arg0: i32) -> (i32, i32) {
    %c0_i32 = arith.constant 0 : i32
    %c0_i32_0 = arith.constant 0 : i32
    return %arg0, %c0_i32 : i32, i32
  }
  func.func @transform_1(%arg0: i32) -> (i32, i32) {
    %c0_i32 = arith.constant 0 : i32
    %c0_i32_0 = arith.constant 0 : i32
    %c0_i32_1 = arith.constant 0 : i32
    return %c0_i32, %c0_i32_0 : i32, i32
  }
  func.func @transform_2(%arg0: i32) -> (i32, i32) {
    %c0_i32 = arith.constant 0 : i32
    %c0_i32_0 = arith.constant 0 : i32
    %c0_i32_1 = arith.constant 0 : i32
    return %c0_i32, %c0_i32_0 : i32, i32
  }
  func.func @transform_3(%arg0: i32) -> (i32, i32) {
    %c0_i32 = arith.constant 0 : i32
    %c0_i32_0 = arith.constant 0 : i32
    %c0_i32_1 = arith.constant 0 : i32
    return %c0_i32, %c0_i32_0 : i32, i32
  }
  func.func @transform_4(%arg0: i32) -> (i32, i32) {
    %c0_i32 = arith.constant 0 : i32
    %c0_i32_0 = arith.constant 0 : i32
    %c0_i32_1 = arith.constant 0 : i32
    return %c0_i32, %c0_i32_0 : i32, i32
  }
  func.func @transform_5(%arg0: i32) -> (i32, i32) {
    %c0_i32 = arith.constant 0 : i32
    %c0_i32_0 = arith.constant 0 : i32
    %c0_i32_1 = arith.constant 0 : i32
    return %c0_i32, %c0_i32_0 : i32, i32
  }
  func.func @transform_6(%arg0: i32) -> (i32, i32) {
    %c0_i32 = arith.constant 0 : i32
    %c0_i32_0 = arith.constant 0 : i32
    %c0_i32_1 = arith.constant 0 : i32
    return %c0_i32, %c0_i32_0 : i32, i32
  }
  func.func @transform_7(%arg0: i32) -> (i32, i32) {
    %c0_i32 = arith.constant 0 : i32
    %c0_i32_0 = arith.constant 0 : i32
    return %arg0, %c0_i32 : i32, i32
  }
}

module attributes {stable_mosaic.version = 11 : i64} {
  func.func @_mlp_kernel(%arg0: i32, %arg1: memref<8x32xf32, #tpu.memory_space<vmem>>, %arg2: memref<32x64xf32, #tpu.memory_space<vmem>>, %arg3: memref<1x64xf32, #tpu.memory_space<vmem>>, %arg4: memref<64x64xf32, #tpu.memory_space<vmem>>, %arg5: memref<1x64xf32, #tpu.memory_space<vmem>>, %arg6: memref<64x16xf32, #tpu.memory_space<vmem>>, %arg7: memref<1x16xf32, #tpu.memory_space<vmem>>, %arg8: memref<8x16xf32, #tpu.memory_space<vmem>>) attributes {dimension_semantics = [#tpu.dimension_semantics<parallel>], iteration_bounds = array<i64: 2>, scalar_prefetch = 0 : i64, scratch_operands = 0 : i64, tpu.core_type = #tpu.core_type<tc>, window_params = [{transform_indices = @transform_0, window_bounds = array<i64: 8, 32>}, {pipeline_mode = #tpu.pipeline_mode<synchronous>, transform_indices = @transform_1, window_bounds = array<i64: 32, 64>}, {pipeline_mode = #tpu.pipeline_mode<synchronous>, transform_indices = @transform_2, window_bounds = array<i64: 1, 64>}, {pipeline_mode = #tpu.pipeline_mode<synchronous>, transform_indices = @transform_3, window_bounds = array<i64: 64, 64>}, {pipeline_mode = #tpu.pipeline_mode<synchronous>, transform_indices = @transform_4, window_bounds = array<i64: 1, 64>}, {pipeline_mode = #tpu.pipeline_mode<synchronous>, transform_indices = @transform_5, window_bounds = array<i64: 64, 16>}, {pipeline_mode = #tpu.pipeline_mode<synchronous>, transform_indices = @transform_6, window_bounds = array<i64: 1, 16>}, {transform_indices = @transform_7, window_bounds = array<i64: 8, 16>}]} {
    %c0 = arith.constant 0 : index
    %c0_0 = arith.constant 0 : index
    %0 = vector.load %arg1[%c0, %c0_0] : memref<8x32xf32, #tpu.memory_space<vmem>>, vector<8x32xf32>
    %c0_1 = arith.constant 0 : index
    %c0_2 = arith.constant 0 : index
    %1 = vector.load %arg2[%c0_1, %c0_2] : memref<32x64xf32, #tpu.memory_space<vmem>>, vector<32x64xf32>
    %c0_3 = arith.constant 0 : index
    %c0_4 = arith.constant 0 : index
    %2 = vector.load %arg3[%c0_3, %c0_4] : memref<1x64xf32, #tpu.memory_space<vmem>>, vector<1x64xf32>
    %cst = arith.constant dense<0.000000e+00> : vector<8x64xf32>
    %3 = tpu.matmul %0, %1, %cst {dimension_numbers = #tpu.dot_dimension_numbers<[1], [0], [0], [1], [0, 0, 1, 1], [], []>} : vector<8x32xf32>, vector<32x64xf32>, vector<8x64xf32> -> vector<8x64xf32>
    %4 = vector.broadcast %2 : vector<1x64xf32> to vector<8x64xf32>
    %5 = arith.addf %3, %4 : vector<8x64xf32>
    %cst_5 = arith.constant 0.000000e+00 : f32
    %6 = vector.broadcast %cst_5 : f32 to vector<8x64xf32>
    %7 = arith.maximumf %5, %6 : vector<8x64xf32>
    %c0_6 = arith.constant 0 : index
    %c0_7 = arith.constant 0 : index
    %8 = vector.load %arg4[%c0_6, %c0_7] : memref<64x64xf32, #tpu.memory_space<vmem>>, vector<64x64xf32>
    %c0_8 = arith.constant 0 : index
    %c0_9 = arith.constant 0 : index
    %9 = vector.load %arg5[%c0_8, %c0_9] : memref<1x64xf32, #tpu.memory_space<vmem>>, vector<1x64xf32>
    %cst_10 = arith.constant dense<0.000000e+00> : vector<8x64xf32>
    %10 = tpu.matmul %7, %8, %cst_10 {dimension_numbers = #tpu.dot_dimension_numbers<[1], [0], [0], [1], [0, 0, 1, 1], [], []>} : vector<8x64xf32>, vector<64x64xf32>, vector<8x64xf32> -> vector<8x64xf32>
    %11 = vector.broadcast %9 : vector<1x64xf32> to vector<8x64xf32>
    %12 = arith.addf %10, %11 : vector<8x64xf32>
    %cst_11 = arith.constant 0.000000e+00 : f32
    %13 = vector.broadcast %cst_11 : f32 to vector<8x64xf32>
    %14 = arith.maximumf %12, %13 : vector<8x64xf32>
    %c0_12 = arith.constant 0 : index
    %c0_13 = arith.constant 0 : index
    %15 = vector.load %arg6[%c0_12, %c0_13] : memref<64x16xf32, #tpu.memory_space<vmem>>, vector<64x16xf32>
    %c0_14 = arith.constant 0 : index
    %c0_15 = arith.constant 0 : index
    %16 = vector.load %arg7[%c0_14, %c0_15] : memref<1x16xf32, #tpu.memory_space<vmem>>, vector<1x16xf32>
    %cst_16 = arith.constant dense<0.000000e+00> : vector<8x16xf32>
    %17 = tpu.matmul %14, %15, %cst_16 {dimension_numbers = #tpu.dot_dimension_numbers<[1], [0], [0], [1], [0, 0, 1, 1], [], []>} : vector<8x64xf32>, vector<64x16xf32>, vector<8x16xf32> -> vector<8x16xf32>
    %18 = vector.broadcast %16 : vector<1x16xf32> to vector<8x16xf32>
    %19 = arith.addf %17, %18 : vector<8x16xf32>
    %c0_17 = arith.constant 0 : index
    %c0_18 = arith.constant 0 : index
    %20 = vector.load %arg8[%c0_17, %c0_18] : memref<8x16xf32, #tpu.memory_space<vmem>>, vector<8x16xf32>
    tpu.vector_store %arg8[%c0_17, %c0_18], %19 {strides = array<i32>} : memref<8x16xf32, #tpu.memory_space<vmem>>, vector<8x16xf32>,
    return
  }
  func.func @transform_0(%arg0: i32) -> (i32, i32) {
    %c0_i32 = arith.constant 0 : i32
    %c0_i32_0 = arith.constant 0 : i32
    return %arg0, %c0_i32 : i32, i32
  }
  func.func @transform_1(%arg0: i32) -> (i32, i32) {
    %c0_i32 = arith.constant 0 : i32
    %c0_i32_0 = arith.constant 0 : i32
    %c0_i32_1 = arith.constant 0 : i32
    return %c0_i32, %c0_i32_0 : i32, i32
  }
  func.func @transform_2(%arg0: i32) -> (i32, i32) {
    %c0_i32 = arith.constant 0 : i32
    %c0_i32_0 = arith.constant 0 : i32
    %c0_i32_1 = arith.constant 0 : i32
    return %c0_i32, %c0_i32_0 : i32, i32
  }
  func.func @transform_3(%arg0: i32) -> (i32, i32) {
    %c0_i32 = arith.constant 0 : i32
    %c0_i32_0 = arith.constant 0 : i32
    %c0_i32_1 = arith.constant 0 : i32
    return %c0_i32, %c0_i32_0 : i32, i32
  }
  func.func @transform_4(%arg0: i32) -> (i32, i32) {
    %c0_i32 = arith.constant 0 : i32
    %c0_i32_0 = arith.constant 0 : i32
    %c0_i32_1 = arith.constant 0 : i32
    return %c0_i32, %c0_i32_0 : i32, i32
  }
  func.func @transform_5(%arg0: i32) -> (i32, i32) {
    %c0_i32 = arith.constant 0 : i32
    %c0_i32_0 = arith.constant 0 : i32
    %c0_i32_1 = arith.constant 0 : i32
    return %c0_i32, %c0_i32_0 : i32, i32
  }
  func.func @transform_6(%arg0: i32) -> (i32, i32) {
    %c0_i32 = arith.constant 0 : i32
    %c0_i32_0 = arith.constant 0 : i32
    %c0_i32_1 = arith.constant 0 : i32
    return %c0_i32, %c0_i32_0 : i32, i32
  }
  func.func @transform_7(%arg0: i32) -> (i32, i32) {
    %c0_i32 = arith.constant 0 : i32
    %c0_i32_0 = arith.constant 0 : i32
    return %arg0, %c0_i32 : i32, i32
  }
}

</mosaic_0001>

<bundles_post_ra>
// kernel: tpu_custom_call.1
= control target key start
LH: loop header
LB: loop body
LE: loop exit
PB: predicated region body
PF: predicated region fallthrough
CT: control target
= control target key end

     0   :  { %12 = vsyncpa [#allocation3], 0  ;;  %s1154_s0 = inlined_call_operand.vmem [shape: f32[16,32], index: 0, kind: input, shape index: {}]   ;;  %s1155_s1 = inlined_call_operand.hbm [shape: f32[32,64], index: 1, kind: input, shape index: {}]   ;;  %s1156_s2 = inlined_call_operand.vmem [shape: f32[1,64], index: 2, kind: input, shape index: {}]   ;;  %s1157_s3 = inlined_call_operand.vmem [shape: f32[64,64], index: 3, kind: input, shape index: {}]   ;;  %s1158_s4 = inlined_call_operand.vmem [shape: f32[1,64], index: 4, kind: input, shape index: {}]   ;;  %s1159_s5 = inlined_call_operand.vmem [shape: f32[64,16], index: 5, kind: input, shape index: {}]   ;;  %s1160_s6 = inlined_call_operand.vmem [shape: f32[1,16], index: 6, kind: input, shape index: {}]   ;;  %s1161_s7 = inlined_call_operand.hbm [shape: f32[16,16], index: 7, kind: output, shape index: {}]  }
   0x1   :  { %13 = vsyncpa [#allocation4], 0 }
   0x2   :  { %15 = vsyncpa [#allocation4 + $0x1], 0  ;;  %s959_s24 = smov 0   ;;  %s961_s25 = smov 0  }
   0x3   :  { %s963_s26 = smov 0   ;;  %s965_s27 = smov 0  }
   0x4 LB: > { %s980_s28 = sadd.s32 4294967295, %s910_s27   ;;  %s641_s29 = sadd.s32 4294967294, %s910_s27   ;;  %s910_s27 = sphi %s965_s27, %s1177_s27   ;;  %s906_s26 = sphi %s963_s26, %s1176_s26   ;;  %s902_s25 = sphi %s961_s25, %s1175_s25   ;;  %s898_s24 = sphi %s959_s24, %s1174_s24  }
   0x5   : > { %s984_s30 = sadd.s32 1, %s910_s27   ;;  %s180_s8 = sadd.s32 1, %s906_s26 }
   0x6   : > { %s177_s9 = ssub.s32 %s910_s27, %s984_s30  ;;  %p190_p0 = scmp.ne.s32.totalorder %s906_s26, %s902_s25 }
   0x7   : > { %p178_p1 = scmp.eq.s32.totalorder %s177_s9, 0  ;;  %p191_p2 = scmp.eq.s32.totalorder %s980_s28, 1 }
   0x8   : > { %p196_p3 = scmp.ne.s32.totalorder %s902_s25, %s898_s24  ;;  %p197_p4 = scmp.eq.s32.totalorder %s641_s29, 1 }
   0x9   : > { %s995_s10 = scalar_select %p178_p1, %s906_s26, %s180_s8  }
   0xa   : > { %p997_p5 = por %p191_p2, %p190_p0  ;;  %p1001_p6 = por %p197_p4, %p196_p3 }
   0xb   : > { %p642_p7 = scmp.ge.s32.totalorder %s910_s27, 1  ;;  %p204_p8 = scmp.lt.s32.totalorder %s910_s27, 3 }
   0xc   : > { %s1165_s11 = scalar_select %p997_p5, 1, 0 }
   0xd   : > { %s1166_s12 = scalar_select %p1001_p6, 1, 0 }
   0xe   : > { %p1162_p9 = scmp.eq.s32.totalorder %s980_s28, 0  ;;  %p1008_p10 = pnand %p642_p7, %p204_p8 }
   0xf   : > { %s912_s14 = smov [#allocation2]   ;;  %s816_s19 = scalar_lea.hbm %s1155_s1, 512 }
  0x10   : > { %s1167_s13 = scalar_select %p1008_p10, 1, 0 }
  0x11   : > { %s216_s15 = sshll.u32 %s912_s14, 4  ;;  %p767_p11 = pneg %p1008_p10  ;;  %s217_s15 = int_to_ptr.vmem [resolvable:$true] %s216_s15 }
  0x12   : > { %p817_p13 = scmp.ne.s32.totalorder %s1155_s1, %s816_s19  ;;  %p823_p3 = scmp.lt.u32.totalorder %s816_s19, %s1155_s1 }
  0x13   : > { %p1016_p12 = pnand %p1162_p9, %p767_p11 }
  0x15   : > { %p818_p0 = pneg %p1016_p12 }
  0x17   : > { %p819_p1 = pnand %p818_p0, %p817_p13 }
  0x19   : > { %p820_p2 = pneg %p819_p1 }
  0x1b   : > { %p825_p4 = pnand %p823_p3, %p820_p2 }
  0x1d   : > { %828 = shalt.err (!%p825_p4)
}
  0x1e   : > { %s829_s29 = scalar_lea.vmem %s217_s15, 512  ;;  %p837_p9 = scmp.lt.s32.totalorder %s217_s15, %s217_s15 }
  0x1f   : > { %p830_p7 = scmp.ne.s32.totalorder %s217_s15, %s829_s29  ;;  %p838_p6 = scmp.lt.s32.totalorder %s829_s29, %s829_s29 }
  0x21   : > { %p832_p8 = pnand %p830_p7, %p818_p0  ;;  %p839_p5 = por %p838_p6, %p837_p9 }
  0x23   : > { %p833_p11 = pneg %p832_p8 }
  0x25   : > { %p840_p10 = pnand %p839_p5, %p833_p11 }
  0x27   : > { %843 = shalt.err (!%p840_p10)
}
  0x28   : > { %s913_s8 = smov 128   ;;  %s914_s9 = smov 8  }
  0x29   : > { %770 = dma.hbm_to_vmem [thread:$0]  (!%p1016_p12), %s1155_s1, 512, %s217_s15, [#allocation3], %s913_s8, %s913_s8, %s914_s9  }
  0x2a   : > { %p1169_p13 = scmp.ne.s32.totalorder %s1167_s13, 0 }
  0x2b   : > { %p1170_p1 = scmp.eq.s32.totalorder (!%p1169_p13), %s980_s28, 0 }
  0x2c   : > { %254 = sbr.rel (%p1169_p13) target bundleno = 722 (0x2d2), region = 48 }
  0x33   : > { %889 = dma.done.wait (%p1170_p1), [#allocation3], 512   ;;  %p1171_p0 = pmov %p1170_p1 }
  0x34   : > { %p285_p5 = scmp.lt.s32.totalorder %s980_s28, 1  ;;  %v915_v0 = vmov 0.0|0.0   ;;  %vm916_vm0 = vmmov 0   ;;  %v917_v1 = vmov 0.0   ;;  %v290_v2 = vld [vmem:[#allocation2] sm:$0xff]  ;;  %v291_v3 = vld [vmem:[#allocation2 + $0x8] sm:$0xff] }
  0x35   : > { %891 = vsyncadd (%p1171_p0), [#allocation3], 4294966784  ;;  %731 = vmatprep.subr.bf16.mxu0 %v915_v0  ;;  %690 = vmatprep.mubr.msk.f32.mxu0 %vm916_vm0, %v917_v1  ;;  %v292_v4 = vld [vmem:[#allocation2 + $0x10] sm:$0xff]  ;;  %v732_v5 = vpack.c.bf16 %v291_v3, %v290_v2  ;;  %v293_v6 = vld [vmem:[#allocation2 + $0x18] sm:$0xff]  ;;  %vm301_vm1 = vcmask 261120   ;;  %vm391_vm2 = vcmask 523264  }
  0x36   : > { %737 = vmatprep.subr.bf16.mxu1 %v915_v0  ;;  %709 = vmatprep.mubr.msk.f32.mxu1 %vm916_vm0, %v917_v1  ;;  %s286_s13 = scalar_select %p285_p5, %s980_s28, 1  ;;  %v376_v7 = vld [vmem:[%s1157_s3] sm:$0xff]  ;;  %v377_v8 = vld [vmem:[%s1157_s3 + $0x8] sm:$0xff]  ;;  %v378_v9 = vld [vmem:[%s1157_s3 + $0x10] sm:$0xff]  ;;  %v735_v11 = vpack.c.bf16 %v293_v6, %v292_v4  ;;  %vm554_vm3 = vcmask 130048  }
  0x37   : > { %v379_v10 = vld [vmem:[%s1157_s3 + $0x18] sm:$0xff]  ;;  %733 = vmatpush3.bf16.msra.mxu0 %v732_v5  ;;  %v738_v12 = vpack.c.bf16 %v377_v8, %v376_v7  ;;  %v380_v14 = vld [vmem:[%s1157_s3 + $0x20] sm:$0xff]  ;;  %v381_v15 = vld [vmem:[%s1157_s3 + $0x28] sm:$0xff]  ;;  %s282_s17 = sand.u32 1, %s902_s25   ;;  %p1172_p9 = scmp.ne.s32.totalorder %s1165_s11, 0 }
  0x38   : > { %s648_s15 = sshll.u32 %s286_s13, 3  ;;  %734 = vmatprep.subr.bf16.mxu0 %v915_v0  ;;  %v741_v13 = vpack.c.bf16 %v379_v10, %v378_v9  ;;  %v744_v17 = vpack.c.bf16 %v381_v15, %v380_v14  ;;  %v382_v18 = vld [vmem:[%s1157_s3 + $0x30] sm:$0xff]  ;;  %v383_v19 = vld [vmem:[%s1157_s3 + $0x38] sm:$0xff]  ;;  %v466_v21 = vld [vmem:[%s1159_s5] sm:$0xff]  ;;  %s647_s13 = sshll.u32 %s282_s17, 3 }
  0x39   : > { %s288_s14 = scalar_lea.vmem %s1154_s0, %s648_s15  ;;  %739 = vmatpush3.bf16.msra.mxu1 %v738_v12  ;;  %v747_v20 = vpack.c.bf16 %v383_v19, %v382_v18  ;;  %v467_v22 = vld [vmem:[%s1159_s5 + $0x8] sm:$0xff]  ;;  %v468_v23 = vld [vmem:[%s1159_s5 + $0x10] sm:$0xff]  ;;  %v469_v25 = vld [vmem:[%s1159_s5 + $0x18] sm:$0xff]  ;;  %s656_s15 = sshll.u32 %s980_s28, 7 }
  0x3a   : > { %740 = vmatprep.subr.bf16.mxu1 %v915_v0  ;;  %v289_v16 = vld [vmem:[%s288_s14] sm:$0xff]  ;;  %v750_v24 = vpack.c.bf16 %v467_v22, %v466_v21  ;;  %v753_v26 = vpack.c.bf16 %v469_v25, %v468_v23  ;;  %v471_v28 = vld [vmem:[%s1159_s5 + $0x28] sm:$0xff]  ;;  %v472_v35 = vld [vmem:[%s1159_s5 + $0x30] sm:$0xff]  ;;  %s284_s19 = scalar_lea.vmem [#allocation5], %s647_s13  ;;  %s1112_s23 = scalar_lea.hbm %s1161_s7, %s656_s15 }
  0x3b   : > { %736 = vmatpush3.bf16.msra.mxu0 %v735_v11  ;;  %v470_v27 = vld [vmem:[%s1159_s5 + $0x20] sm:$0xff]  ;;  %v473_v36 = vld [vmem:[%s1159_s5 + $0x38] sm:$0xff]  ;;  %s570_s20 = sshll.u32 %s284_s19, 4  ;;  %s557_s29 = scalar_lea.sflag [#allocation4], %s282_s17  ;;  %s1114_s20 = int_to_ptr.vmem [resolvable:$true] %s570_s20 }
  0x3c   : > { %749 = vmatprep.subr.bf16.mxu0 %v915_v0  ;;  %v756_v29 = vpack.c.bf16 %v471_v28, %v470_v27  ;;  %v649_v30 = vld [vmem:[%s1156_s2] ss:$0 sm:$0xff]  ;;  %v759_v37 = vpack.c.bf16 %v473_v36, %v472_v35  ;;  %s844_s8 = scalar_lea.vmem %s1114_s20, 128  ;;  %s918_s28 = smov [#allocation5]  }
  0x3d   : > { %742 = vmatpush3.bf16.msra.mxu1 %v741_v13  ;;  %v651_v38 = vld [vmem:[%s1158_s4] ss:$0 sm:$0xff]  ;;  %p845_p6 = scmp.ne.s32.totalorder %s1114_s20, %s844_s8  ;;  %s848_s9 = sshll.u32 %s918_s28, 4  ;;  %s849_s9 = int_to_ptr.vmem [resolvable:$false] %s848_s9 }
  0x3e   : > { %691 = vmatmul.mubr.msk.f32.vlgmr.msra.gmra.mrb[0].mxu0 %vm301_vm1, %v289_v16  ;;  %743 = vmatprep.subr.bf16.mxu1 %v915_v0  ;;  %v653_v43 = vld [vmem:[%s1160_s6] ss:$0 sm:$0xff]  ;;  %s850_s14 = scalar_lea.vmem %s849_s9, 256  ;;  %p851_p2 = scmp.lt.s32.totalorder %s1114_s20, %s849_s9 }
  0x3f   : > { %728 = vmatprep.mubr.msk.f32.mxu0 %vm916_vm0, %v917_v1  ;;  %751 = vmatpush3.bf16.msra.mxu0 %v750_v24  ;;  %p846_p10 = pnand %p845_p6, %p1172_p9  ;;  %p852_p3 = scmp.lt.s32.totalorder %s850_s14, %s844_s8 }
  0x40   : > { %752 = vmatprep.subr.bf16.mxu0 %v915_v0 }
  0x41   : > { %745 = vmatpush3.bf16.msra.mxu1 %v744_v17  ;;  %p847_p12 = pneg %p846_p10  ;;  %p853_p4 = por %p852_p3, %p851_p2 }
  0x42   : > { %746 = vmatprep.subr.bf16.mxu1 %v915_v0 }
  0x43   : > { %754 = vmatpush3.bf16.msra.mxu0 %v753_v26  ;;  %p854_p7 = pnand %p853_p4, %p847_p12 }
  0x44   : > { %755 = vmatprep.subr.bf16.mxu0 %v915_v0 }
  0x45   : > { %748 = vmatpush3.bf16.msra.mxu1 %v747_v20 }
  0x47   : > { %757 = vmatpush3.bf16.msra.mxu0 %v756_v29 }
  0x48   : > { %758 = vmatprep.subr.bf16.mxu0 %v915_v0 }
  0x4b   : > { %760 = vmatpush3.bf16.msra.mxu0 %v759_v37 }
 0x111   : > { %v371_v31 = vpop.f32.mrb[0].mxu0 }
 0x112   : > { %v372_v32 = vadd.f32 %v649_v30, %v371_v31  ;;  %v692_v33 = vpop.f32.mrb[1].mxu0 }
 0x114   : > { %v375_v34 = vmax.f32 %v372_v32, 0.0 }
 0x116   : > { %710 = vmatmul.mubr.msk.f32.vlgmr.msra.gmra.mrb[0].mxu1 %vm391_vm2, %v375_v34 }
 0x1e9   : > { %v461_v39 = vpop.f32.mrb[0].mxu1 }
 0x1ea   : > { %v462_v40 = vadd.f32 %v651_v38, %v461_v39  ;;  %v711_v41 = vpop.f32.mrb[1].mxu1 }
 0x1ec   : > { %v465_v42 = vmax.f32 %v462_v40, 0.0 }
 0x1ee   : > { %729 = vmatmul.mubr.msk.f32.vlgmr.msra.gmra.mrb[2].mxu0 %vm391_vm2, %v465_v42 }
 0x2c1   : > { %v550_v44 = vpop.f32.mrb[2].mxu0 }
 0x2c2   : > { %v551_v45 = vadd.f32 %v653_v43, %v550_v44  ;;  %v730_v46 = vpop.f32.mrb[3].mxu0 }
 0x2c4   : > { %555 = vst.msk [vmem:[%s284_s19] sm:$0xff] %vm554_vm3, %v551_v45 }
 0x2c5   : > { %857 = shalt.err (!%p854_p7)
}
 0x2c6   : > { %s858_s17 = scalar_lea.hbm %s1112_s23, 128  ;;  %s862_s18 = scalar_lea.hbm %s1161_s7, 256 }
 0x2c7   : > { %p859_p8 = scmp.ne.s32.totalorder %s1112_s23, %s858_s17  ;;  %p863_p1 = scmp.lt.u32.totalorder %s1112_s23, %s1161_s7 }
 0x2c8   : > { %p864_p0 = scmp.lt.u32.totalorder %s862_s18, %s858_s17  ;;  %p866_p6 = scmp.lt.u32.totalorder %s858_s17, %s1112_s23 }
 0x2c9   : > { %p860_p11 = pnand %p859_p8, %p1172_p9 }
 0x2ca   : > { %p865_p5 = por %p864_p0, %p863_p1 }
 0x2cb   : > { %p861_p13 = pneg %p860_p11 }
 0x2cc   : > { %p867_p10 = por %p866_p6, %p865_p5 }
 0x2ce   : > { %p868_p12 = pnand %p867_p10, %p861_p13 }
 0x2d0   : > { %871 = shalt.err (!%p868_p12)
}
 0x2d1   : > { %765 = dma.vmem_to_hbm [thread:$0]  (%p1172_p9), %s1114_s20, 128, %s1112_s23, %s557_s29  }
 0x2d2 PF: > { %p777_p2 = scmp.ge.s32.totalorder %s910_s27, 2  ;;  %s582_s21 = sand.u32 1, %s898_s24  }
 0x2d3   : > { %p1173_p3 = scmp.ne.s32.totalorder %s1166_s12, 0  ;;  %s583_s22 = scalar_lea.sflag [#allocation4], %s582_s21 }
 0x2d5   : > { %p772_p4 = pnand %p777_p2, %p1173_p3 }
 0x2d7   : > { %893 = dma.done.wait (!%p772_p4), %s583_s22, 128  }
 0x2d8   : > { %895 = vsyncadd (!%p772_p4), %s583_s22, 4294967168  ;;  %p18_p7 = scmp.ge.s32.totalorder %s984_s30, 4   ;;  %s1174_s24 = smov %s902_s25 }
 0x2d9   : > { %s1175_s25 = smov %s906_s26  ;;  %s1176_s26 = smov %s995_s10 }
 0x2da   : > { %s1177_s27 = smov %s984_s30  ;;  %20 = sbr.rel (!%p18_p7) target bundleno = 4 (0x4), region = 88 }
 0x2e1   :  { %588 = vsyncpa [#allocation3], 1 }
 0x2e2   :  { %590 = vsyncpa [#allocation3 + $0x1], 1 }
 0x2e3   :  { %591 = vsyncpa [#allocation4], 1 }
 0x2e4   :  { %593 = vsyncpa [#allocation4 + $0x1], 1 }

// kernel: tpu_custom_call.1
= control target key start
LH: loop header
LB: loop body
LE: loop exit
PB: predicated region body
PF: predicated region fallthrough
CT: control target
= control target key end

     0   :  { %12 = vsyncpa [#allocation3], 0  ;;  %s1154_s0 = inlined_call_operand.vmem [shape: f32[16,32], index: 0, kind: input, shape index: {}]   ;;  %s1155_s1 = inlined_call_operand.hbm [shape: f32[32,64], index: 1, kind: input, shape index: {}]   ;;  %s1156_s2 = inlined_call_operand.vmem [shape: f32[1,64], index: 2, kind: input, shape index: {}]   ;;  %s1157_s3 = inlined_call_operand.vmem [shape: f32[64,64], index: 3, kind: input, shape index: {}]   ;;  %s1158_s4 = inlined_call_operand.vmem [shape: f32[1,64], index: 4, kind: input, shape index: {}]   ;;  %s1159_s5 = inlined_call_operand.vmem [shape: f32[64,16], index: 5, kind: input, shape index: {}]   ;;  %s1160_s6 = inlined_call_operand.vmem [shape: f32[1,16], index: 6, kind: input, shape index: {}]   ;;  %s1161_s7 = inlined_call_operand.hbm [shape: f32[16,16], index: 7, kind: output, shape index: {}]  }
   0x1   :  { %13 = vsyncpa [#allocation4], 0 }
   0x2   :  { %15 = vsyncpa [#allocation4 + $0x1], 0  ;;  %s959_s24 = smov 0   ;;  %s961_s25 = smov 0  }
   0x3   :  { %s963_s26 = smov 0   ;;  %s965_s27 = smov 0  }
   0x4 LB: > { %s980_s28 = sadd.s32 4294967295, %s910_s27   ;;  %s641_s29 = sadd.s32 4294967294, %s910_s27   ;;  %s910_s27 = sphi %s965_s27, %s1177_s27   ;;  %s906_s26 = sphi %s963_s26, %s1176_s26   ;;  %s902_s25 = sphi %s961_s25, %s1175_s25   ;;  %s898_s24 = sphi %s959_s24, %s1174_s24  }
   0x5   : > { %s984_s30 = sadd.s32 1, %s910_s27   ;;  %s180_s8 = sadd.s32 1, %s906_s26 }
   0x6   : > { %s177_s9 = ssub.s32 %s910_s27, %s984_s30  ;;  %p190_p0 = scmp.ne.s32.totalorder %s906_s26, %s902_s25 }
   0x7   : > { %p178_p1 = scmp.eq.s32.totalorder %s177_s9, 0  ;;  %p191_p2 = scmp.eq.s32.totalorder %s980_s28, 1 }
   0x8   : > { %p196_p3 = scmp.ne.s32.totalorder %s902_s25, %s898_s24  ;;  %p197_p4 = scmp.eq.s32.totalorder %s641_s29, 1 }
   0x9   : > { %s995_s10 = scalar_select %p178_p1, %s906_s26, %s180_s8  }
   0xa   : > { %p997_p5 = por %p191_p2, %p190_p0  ;;  %p1001_p6 = por %p197_p4, %p196_p3 }
   0xb   : > { %p642_p7 = scmp.ge.s32.totalorder %s910_s27, 1  ;;  %p204_p8 = scmp.lt.s32.totalorder %s910_s27, 3 }
   0xc   : > { %s1165_s11 = scalar_select %p997_p5, 1, 0 }
   0xd   : > { %s1166_s12 = scalar_select %p1001_p6, 1, 0 }
   0xe   : > { %p1162_p9 = scmp.eq.s32.totalorder %s980_s28, 0  ;;  %p1008_p10 = pnand %p642_p7, %p204_p8 }
   0xf   : > { %s912_s14 = smov [#allocation2]   ;;  %s816_s19 = scalar_lea.hbm %s1155_s1, 512 }
  0x10   : > { %s1167_s13 = scalar_select %p1008_p10, 1, 0 }
  0x11   : > { %s216_s15 = sshll.u32 %s912_s14, 4  ;;  %p767_p11 = pneg %p1008_p10  ;;  %s217_s15 = int_to_ptr.vmem [resolvable:$true] %s216_s15 }
  0x12   : > { %p817_p13 = scmp.ne.s32.totalorder %s1155_s1, %s816_s19  ;;  %p823_p3 = scmp.lt.u32.totalorder %s816_s19, %s1155_s1 }
  0x13   : > { %p1016_p12 = pnand %p1162_p9, %p767_p11 }
  0x15   : > { %p818_p0 = pneg %p1016_p12 }
  0x17   : > { %p819_p1 = pnand %p818_p0, %p817_p13 }
  0x19   : > { %p820_p2 = pneg %p819_p1 }
  0x1b   : > { %p825_p4 = pnand %p823_p3, %p820_p2 }
  0x1d   : > { %828 = shalt.err (!%p825_p4)
}
  0x1e   : > { %s829_s29 = scalar_lea.vmem %s217_s15, 512  ;;  %p837_p9 = scmp.lt.s32.totalorder %s217_s15, %s217_s15 }
  0x1f   : > { %p830_p7 = scmp.ne.s32.totalorder %s217_s15, %s829_s29  ;;  %p838_p6 = scmp.lt.s32.totalorder %s829_s29, %s829_s29 }
  0x21   : > { %p832_p8 = pnand %p830_p7, %p818_p0  ;;  %p839_p5 = por %p838_p6, %p837_p9 }
  0x23   : > { %p833_p11 = pneg %p832_p8 }
  0x25   : > { %p840_p10 = pnand %p839_p5, %p833_p11 }
  0x27   : > { %843 = shalt.err (!%p840_p10)
}
  0x28   : > { %s913_s8 = smov 128   ;;  %s914_s9 = smov 8  }
  0x29   : > { %770 = dma.hbm_to_vmem [thread:$0]  (!%p1016_p12), %s1155_s1, 512, %s217_s15, [#allocation3], %s913_s8, %s913_s8, %s914_s9  }
  0x2a   : > { %p1169_p13 = scmp.ne.s32.totalorder %s1167_s13, 0 }
  0x2b   : > { %p1170_p1 = scmp.eq.s32.totalorder (!%p1169_p13), %s980_s28, 0 }
  0x2c   : > { %254 = sbr.rel (%p1169_p13) target bundleno = 722 (0x2d2), region = 48 }
  0x33   : > { %889 = dma.done.wait (%p1170_p1), [#allocation3], 512   ;;  %p1171_p0 = pmov %p1170_p1 }
  0x34   : > { %p285_p5 = scmp.lt.s32.totalorder %s980_s28, 1  ;;  %v915_v0 = vmov 0.0|0.0   ;;  %vm916_vm0 = vmmov 0   ;;  %v917_v1 = vmov 0.0   ;;  %v290_v2 = vld [vmem:[#allocation2] sm:$0xff]  ;;  %v291_v3 = vld [vmem:[#allocation2 + $0x8] sm:$0xff] }
  0x35   : > { %891 = vsyncadd (%p1171_p0), [#allocation3], 4294966784  ;;  %731 = vmatprep.subr.bf16.mxu0 %v915_v0  ;;  %690 = vmatprep.mubr.msk.f32.mxu0 %vm916_vm0, %v917_v1  ;;  %v292_v4 = vld [vmem:[#allocation2 + $0x10] sm:$0xff]  ;;  %v732_v5 = vpack.c.bf16 %v291_v3, %v290_v2  ;;  %v293_v6 = vld [vmem:[#allocation2 + $0x18] sm:$0xff]  ;;  %vm301_vm1 = vcmask 261120   ;;  %vm391_vm2 = vcmask 523264  }
  0x36   : > { %737 = vmatprep.subr.bf16.mxu1 %v915_v0  ;;  %709 = vmatprep.mubr.msk.f32.mxu1 %vm916_vm0, %v917_v1  ;;  %s286_s13 = scalar_select %p285_p5, %s980_s28, 1  ;;  %v376_v7 = vld [vmem:[%s1157_s3] sm:$0xff]  ;;  %v377_v8 = vld [vmem:[%s1157_s3 + $0x8] sm:$0xff]  ;;  %v378_v9 = vld [vmem:[%s1157_s3 + $0x10] sm:$0xff]  ;;  %v735_v11 = vpack.c.bf16 %v293_v6, %v292_v4  ;;  %vm554_vm3 = vcmask 130048  }
  0x37   : > { %v379_v10 = vld [vmem:[%s1157_s3 + $0x18] sm:$0xff]  ;;  %733 = vmatpush3.bf16.msra.mxu0 %v732_v5  ;;  %v738_v12 = vpack.c.bf16 %v377_v8, %v376_v7  ;;  %v380_v14 = vld [vmem:[%s1157_s3 + $0x20] sm:$0xff]  ;;  %v381_v15 = vld [vmem:[%s1157_s3 + $0x28] sm:$0xff]  ;;  %s282_s17 = sand.u32 1, %s902_s25   ;;  %p1172_p9 = scmp.ne.s32.totalorder %s1165_s11, 0 }
  0x38   : > { %s648_s15 = sshll.u32 %s286_s13, 3  ;;  %734 = vmatprep.subr.bf16.mxu0 %v915_v0  ;;  %v741_v13 = vpack.c.bf16 %v379_v10, %v378_v9  ;;  %v744_v17 = vpack.c.bf16 %v381_v15, %v380_v14  ;;  %v382_v18 = vld [vmem:[%s1157_s3 + $0x30] sm:$0xff]  ;;  %v383_v19 = vld [vmem:[%s1157_s3 + $0x38] sm:$0xff]  ;;  %v466_v21 = vld [vmem:[%s1159_s5] sm:$0xff]  ;;  %s647_s13 = sshll.u32 %s282_s17, 3 }
  0x39   : > { %s288_s14 = scalar_lea.vmem %s1154_s0, %s648_s15  ;;  %739 = vmatpush3.bf16.msra.mxu1 %v738_v12  ;;  %v747_v20 = vpack.c.bf16 %v383_v19, %v382_v18  ;;  %v467_v22 = vld [vmem:[%s1159_s5 + $0x8] sm:$0xff]  ;;  %v468_v23 = vld [vmem:[%s1159_s5 + $0x10] sm:$0xff]  ;;  %v469_v25 = vld [vmem:[%s1159_s5 + $0x18] sm:$0xff]  ;;  %s656_s15 = sshll.u32 %s980_s28, 7 }
  0x3a   : > { %740 = vmatprep.subr.bf16.mxu1 %v915_v0  ;;  %v289_v16 = vld [vmem:[%s288_s14] sm:$0xff]  ;;  %v750_v24 = vpack.c.bf16 %v467_v22, %v466_v21  ;;  %v753_v26 = vpack.c.bf16 %v469_v25, %v468_v23  ;;  %v471_v28 = vld [vmem:[%s1159_s5 + $0x28] sm:$0xff]  ;;  %v472_v35 = vld [vmem:[%s1159_s5 + $0x30] sm:$0xff]  ;;  %s284_s19 = scalar_lea.vmem [#allocation5], %s647_s13  ;;  %s1112_s23 = scalar_lea.hbm %s1161_s7, %s656_s15 }
  0x3b   : > { %736 = vmatpush3.bf16.msra.mxu0 %v735_v11  ;;  %v470_v27 = vld [vmem:[%s1159_s5 + $0x20] sm:$0xff]  ;;  %v473_v36 = vld [vmem:[%s1159_s5 + $0x38] sm:$0xff]  ;;  %s570_s20 = sshll.u32 %s284_s19, 4  ;;  %s557_s29 = scalar_lea.sflag [#allocation4], %s282_s17  ;;  %s1114_s20 = int_to_ptr.vmem [resolvable:$true] %s570_s20 }
  0x3c   : > { %749 = vmatprep.subr.bf16.mxu0 %v915_v0  ;;  %v756_v29 = vpack.c.bf16 %v471_v28, %v470_v27  ;;  %v649_v30 = vld [vmem:[%s1156_s2] ss:$0 sm:$0xff]  ;;  %v759_v37 = vpack.c.bf16 %v473_v36, %v472_v35  ;;  %s844_s8 = scalar_lea.vmem %s1114_s20, 128  ;;  %s918_s28 = smov [#allocation5]  }
  0x3d   : > { %742 = vmatpush3.bf16.msra.mxu1 %v741_v13  ;;  %v651_v38 = vld [vmem:[%s1158_s4] ss:$0 sm:$0xff]  ;;  %p845_p6 = scmp.ne.s32.totalorder %s1114_s20, %s844_s8  ;;  %s848_s9 = sshll.u32 %s918_s28, 4  ;;  %s849_s9 = int_to_ptr.vmem [resolvable:$false] %s848_s9 }
  0x3e   : > { %691 = vmatmul.mubr.msk.f32.vlgmr.msra.gmra.mrb[0].mxu0 %vm301_vm1, %v289_v16  ;;  %743 = vmatprep.subr.bf16.mxu1 %v915_v0  ;;  %v653_v43 = vld [vmem:[%s1160_s6] ss:$0 sm:$0xff]  ;;  %s850_s14 = scalar_lea.vmem %s849_s9, 256  ;;  %p851_p2 = scmp.lt.s32.totalorder %s1114_s20, %s849_s9 }
  0x3f   : > { %728 = vmatprep.mubr.msk.f32.mxu0 %vm916_vm0, %v917_v1  ;;  %751 = vmatpush3.bf16.msra.mxu0 %v750_v24  ;;  %p846_p10 = pnand %p845_p6, %p1172_p9  ;;  %p852_p3 = scmp.lt.s32.totalorder %s850_s14, %s844_s8 }
  0x40   : > { %752 = vmatprep.subr.bf16.mxu0 %v915_v0 }
  0x41   : > { %745 = vmatpush3.bf16.msra.mxu1 %v744_v17  ;;  %p847_p12 = pneg %p846_p10  ;;  %p853_p4 = por %p852_p3, %p851_p2 }
  0x42   : > { %746 = vmatprep.subr.bf16.mxu1 %v915_v0 }
  0x43   : > { %754 = vmatpush3.bf16.msra.mxu0 %v753_v26  ;;  %p854_p7 = pnand %p853_p4, %p847_p12 }
  0x44   : > { %755 = vmatprep.subr.bf16.mxu0 %v915_v0 }
  0x45   : > { %748 = vmatpush3.bf16.msra.mxu1 %v747_v20 }
  0x47   : > { %757 = vmatpush3.bf16.msra.mxu0 %v756_v29 }
  0x48   : > { %758 = vmatprep.subr.bf16.mxu0 %v915_v0 }
  0x4b   : > { %760 = vmatpush3.bf16.msra.mxu0 %v759_v37 }
 0x111   : > { %v371_v31 = vpop.f32.mrb[0].mxu0 }
 0x112   : > { %v372_v32 = vadd.f32 %v649_v30, %v371_v31  ;;  %v692_v33 = vpop.f32.mrb[1].mxu0 }
 0x114   : > { %v375_v34 = vmax.f32 %v372_v32, 0.0 }
 0x116   : > { %710 = vmatmul.mubr.msk.f32.vlgmr.msra.gmra.mrb[0].mxu1 %vm391_vm2, %v375_v34 }
 0x1e9   : > { %v461_v39 = vpop.f32.mrb[0].mxu1 }
 0x1ea   : > { %v462_v40 = vadd.f32 %v651_v38, %v461_v39  ;;  %v711_v41 = vpop.f32.mrb[1].mxu1 }
 0x1ec   : > { %v465_v42 = vmax.f32 %v462_v40, 0.0 }
 0x1ee   : > { %729 = vmatmul.mubr.msk.f32.vlgmr.msra.gmra.mrb[2].mxu0 %vm391_vm2, %v465_v42 }
 0x2c1   : > { %v550_v44 = vpop.f32.mrb[2].mxu0 }
 0x2c2   : > { %v551_v45 = vadd.f32 %v653_v43, %v550_v44  ;;  %v730_v46 = vpop.f32.mrb[3].mxu0 }
 0x2c4   : > { %555 = vst.msk [vmem:[%s284_s19] sm:$0xff] %vm554_vm3, %v551_v45 }
 0x2c5   : > { %857 = shalt.err (!%p854_p7)
}
 0x2c6   : > { %s858_s17 = scalar_lea.hbm %s1112_s23, 128  ;;  %s862_s18 = scalar_lea.hbm %s1161_s7, 256 }
 0x2c7   : > { %p859_p8 = scmp.ne.s32.totalorder %s1112_s23, %s858_s17  ;;  %p863_p1 = scmp.lt.u32.totalorder %s1112_s23, %s1161_s7 }
 0x2c8   : > { %p864_p0 = scmp.lt.u32.totalorder %s862_s18, %s858_s17  ;;  %p866_p6 = scmp.lt.u32.totalorder %s858_s17, %s1112_s23 }
 0x2c9   : > { %p860_p11 = pnand %p859_p8, %p1172_p9 }
 0x2ca   : > { %p865_p5 = por %p864_p0, %p863_p1 }
 0x2cb   : > { %p861_p13 = pneg %p860_p11 }
 0x2cc   : > { %p867_p10 = por %p866_p6, %p865_p5 }
 0x2ce   : > { %p868_p12 = pnand %p867_p10, %p861_p13 }
 0x2d0   : > { %871 = shalt.err (!%p868_p12)
}
 0x2d1   : > { %765 = dma.vmem_to_hbm [thread:$0]  (%p1172_p9), %s1114_s20, 128, %s1112_s23, %s557_s29  }
 0x2d2 PF: > { %p777_p2 = scmp.ge.s32.totalorder %s910_s27, 2  ;;  %s582_s21 = sand.u32 1, %s898_s24  }
 0x2d3   : > { %p1173_p3 = scmp.ne.s32.totalorder %s1166_s12, 0  ;;  %s583_s22 = scalar_lea.sflag [#allocation4], %s582_s21 }
 0x2d5   : > { %p772_p4 = pnand %p777_p2, %p1173_p3 }
 0x2d7   : > { %893 = dma.done.wait (!%p772_p4), %s583_s22, 128  }
 0x2d8   : > { %895 = vsyncadd (!%p772_p4), %s583_s22, 4294967168  ;;  %p18_p7 = scmp.ge.s32.totalorder %s984_s30, 4   ;;  %s1174_s24 = smov %s902_s25 }
 0x2d9   : > { %s1175_s25 = smov %s906_s26  ;;  %s1176_s26 = smov %s995_s10 }
 0x2da   : > { %s1177_s27 = smov %s984_s30  ;;  %20 = sbr.rel (!%p18_p7) target bundleno = 4 (0x4), region = 88 }
 0x2e1   :  { %588 = vsyncpa [#allocation3], 1 }
 0x2e2   :  { %590 = vsyncpa [#allocation3 + $0x1], 1 }
 0x2e3   :  { %591 = vsyncpa [#allocation4], 1 }
 0x2e4   :  { %593 = vsyncpa [#allocation4 + $0x1], 1 }

</bundles_post_ra>
